<compile_context>
chip_gen: v5e
topology: v5e:2x2
jax: 0.10.0
libtpu: 0.0.40
codegen_flags: <defaults>
</compile_context>

<pallas_src>
import functools

import jax
import jax.numpy as jnp
from jax.experimental import pallas as pl
from jax.experimental.pallas import tpu as pltpu


# ----------------------------------------------------------------------------
# helpers for tile-size selection (must divide the dim and respect (8,128))
# ----------------------------------------------------------------------------
def _largest_divisor_leq(n, target):
    t = max(1, min(n, target))
    while n % t:
        t -= 1
    return t


def _pick_tile(dim, target, align):
    """Largest tile <= target that divides dim and is a multiple of `align`,
    falling back to the full dim (always a legal block size)."""
    if dim <= target:
        return dim
    t = (target // align) * align
    while t >= align:
        if dim % t == 0:
            return t
        t -= align
    return dim


# ----------------------------------------------------------------------------
# tiled dense linear: y = x @ w + b
# ----------------------------------------------------------------------------
def _linear_kernel(x_ref, w_ref, b_ref, o_ref, acc_ref):
    @pl.when(pl.program_id(2) == 0)
    def _():
        acc_ref[...] = jnp.zeros_like(acc_ref)

    acc_ref[...] += jnp.dot(
        x_ref[...], w_ref[...], preferred_element_type=jnp.float32
    )

    @pl.when(pl.program_id(2) == pl.num_programs(2) - 1)
    def _():
        o_ref[...] = acc_ref[...] + b_ref[...]


def pallas_linear(x, w, b, *, tm_target=512, tn_target=256, tk_target=512):
    """x: (M,K) f32, w: (K,N) f32, b: (N,) f32 -> (M,N) f32."""
    M, K = x.shape
    K2, N = w.shape
    assert K == K2
    tm = _pick_tile(M, tm_target, 8)
    tn = _pick_tile(N, tn_target, 128)
    tk = _pick_tile(K, tk_target, 128)
    grid = (M // tm, N // tn, K // tk)

    return pl.pallas_call(
        _linear_kernel,
        out_shape=jax.ShapeDtypeStruct((M, N), jnp.float32),
        grid=grid,
        in_specs=[
            pl.BlockSpec((tm, tk), lambda i, j, k: (i, k)),
            pl.BlockSpec((tk, tn), lambda i, j, k: (k, j)),
            pl.BlockSpec((1, tn), lambda i, j, k: (0, j)),
        ],
        out_specs=pl.BlockSpec((tm, tn), lambda i, j, k: (i, j)),
        scratch_shapes=[pltpu.VMEM((tm, tn), jnp.float32)],
        compiler_params=pltpu.CompilerParams(
            dimension_semantics=("parallel", "parallel", "arbitrary")
        ),
    )(x, w, b.reshape(1, N))


# ----------------------------------------------------------------------------
# per-chunk LSH attention kernel (Cb fused chunks per grid step)
# ----------------------------------------------------------------------------
def _lsh_chunk_kernel(
    qk_ref,       # (1, Cb, bs, e)   raw sorted qk chunks (queries + current keys)
    qk_prev_ref,  # (1, 1,  bs, e)   chunk preceding the block (look-one-back keys)
    v_ref,        # (1, Cb, bs, e)   values
    v_prev_ref,   # (1, 1,  bs, e)
    qm_ref,       # (1, Cb, bs, 2+2h) int32 [pos, bucket, dup-locs...]
    km_ref,       # (1, Cb, 2+2h, bs) int32 transposed key metadata
    km_prev_ref,  # (1, 1,  2+2h, bs)
    bo_ref,       # (1, Cb, bs, e)   output
    lse_ref,      # (1, Cb, bs, 1)   logsumexp
    *,
    causal,
):
    _, cb, bs, e = qk_ref.shape
    mw = qm_ref.shape[-1]
    two_h = mw - 2
    scale = float(e) ** -0.5

    def unit_bf16(x):
        # matches make_unit_length eps convention: x / (||x|| + 1e-6)
        s = jnp.sum(x * x, axis=-1, keepdims=True)
        return (x * (1.0 / (jnp.sqrt(s) + 1e-6))).astype(jnp.bfloat16)

    # look-one-back state carried across the (unrolled) chunk loop
    prev_k16 = unit_bf16(qk_prev_ref[0, 0])
    prev_v16 = v_prev_ref[0, 0].astype(jnp.bfloat16)
    prev_km = km_prev_ref[0, 0]

    for c in range(cb):
        cur_raw = qk_ref[0, c]
        cur_k16 = unit_bf16(cur_raw)          # normalize once per chunk
        cur_v16 = v_ref[0, c].astype(jnp.bfloat16)
        cur_km = km_ref[0, c]

        q16 = cur_raw.astype(jnp.bfloat16)    # queries stay un-normalized
        qm = qm_ref[0, c]
        qpos = qm[:, 0:1]                     # (bs,1)
        qbkt = qm[:, 1:2]

        def scores(k16, kmT):
            d = jax.lax.dot_general(
                q16, k16, (((1,), (1,)), ((), ())),
                preferred_element_type=jnp.float32,
            ) * scale                                           # (bs, bs)
            kpos = kmT[0:1, :]
            kbkt = kmT[1:2, :]
            # fused mask penalties (additive, same constants as the reference)
            pen = (jnp.where(qpos == kpos, 1e5, 0.0)
                   + jnp.where(qbkt != kbkt, 1e7, 0.0))
            if causal:
                pen = pen + jnp.where(qpos < kpos, 1e9, 0.0)
            # duplicate-attention counts
            dup = (qm[:, 2:3] == kmT[2:3, :]).astype(jnp.float32)
            for t in range(1, two_h):
                dup = dup + (
                    qm[:, 2 + t:3 + t] == kmT[2 + t:3 + t, :]
                ).astype(jnp.float32)
            return d - pen - jnp.log(dup + 1e-9)

        d_c = scores(cur_k16, cur_km)         # current-chunk keys half
        d_p = scores(prev_k16, prev_km)       # look-one-back keys half

        # single-exp stable softmax over the two halves
        m = jnp.maximum(jnp.max(d_c, axis=-1, keepdims=True),
                        jnp.max(d_p, axis=-1, keepdims=True))
        e_c = jnp.exp(d_c - m)
        e_p = jnp.exp(d_p - m)
        sexp = (jnp.sum(e_c, axis=-1, keepdims=True)
                + jnp.sum(e_p, axis=-1, keepdims=True))
        lse = m + jnp.log(sexp)

        acc = (jnp.dot(e_c.astype(jnp.bfloat16), cur_v16,
                       preferred_element_type=jnp.float32)
               + jnp.dot(e_p.astype(jnp.bfloat16), prev_v16,
                         preferred_element_type=jnp.float32))
        bo_ref[0, c, :, :] = acc * pl.reciprocal(sexp, approx=True)
        lse_ref[0, c, :, :] = lse

        prev_k16, prev_v16, prev_km = cur_k16, cur_v16, cur_km


def lsh_chunk_attention(sqk_c, sv_c, qmeta, kmetaT, *, causal):
    BH, C, bs, e = sqk_c.shape
    mw = qmeta.shape[-1]
    # fuse enough chunks per step to reach ~512 sorted rows per DMA
    Cb = _largest_divisor_leq(C, max(1, 512 // bs))
    nblk = C // Cb

    cur = lambda i, j: (i, j, 0, 0)
    prev = lambda i, j: (i, (j * Cb + C - 1) % C, 0, 0)   # torch-roll wrap

    kernel = functools.partial(_lsh_chunk_kernel, causal=causal)

    bo, lse = pl.pallas_call(
        kernel,
        out_shape=(
            jax.ShapeDtypeStruct((BH, C, bs, e), jnp.float32),
            jax.ShapeDtypeStruct((BH, C, bs, 1), jnp.float32),
        ),
        grid=(BH, nblk),
        in_specs=[
            pl.BlockSpec((1, Cb, bs, e), cur),     # qk current block
            pl.BlockSpec((1, 1, bs, e), prev),     # qk previous chunk
            pl.BlockSpec((1, Cb, bs, e), cur),     # v current block
            pl.BlockSpec((1, 1, bs, e), prev),     # v previous chunk
            pl.BlockSpec((1, Cb, bs, mw), cur),    # packed query metadata
            pl.BlockSpec((1, Cb, mw, bs), cur),    # packed key metadata (T)
            pl.BlockSpec((1, 1, mw, bs), prev),    # key metadata of prev chunk
        ],
        out_specs=(
            pl.BlockSpec((1, Cb, bs, e), cur),
            pl.BlockSpec((1, Cb, bs, 1), cur),
        ),
        compiler_params=pltpu.CompilerParams(
            dimension_semantics=("parallel", "parallel")
        ),
    )(sqk_c, sqk_c, sv_c, sv_c, qmeta, kmetaT, kmetaT)
    return bo, lse


# ----------------------------------------------------------------------------
# LSH attention (glue: hashing / sorting / gathering; kernel: chunk attention)
# ----------------------------------------------------------------------------
def lsh_attention(qk, v, *, bucket_size, n_hashes, causal, rotation_key):
    bh, seqlen, e = qk.shape
    n_buckets = seqlen // bucket_size
    assert n_buckets % 2 == 0
    chunks = n_hashes * n_buckets

    # ---- hash_vectors (dropout rates are 0.0 -> identity) -------------------
    rot = jax.random.normal(
        rotation_key, (e, n_hashes, n_buckets // 2), dtype=jnp.float32
    )
    rot_flat = rot.reshape(e, n_hashes * (n_buckets // 2))
    zero_bias = jnp.zeros((rot_flat.shape[1],), jnp.float32)
    rotated = pallas_linear(qk.reshape(bh * seqlen, e), rot_flat, zero_bias)
    rotated = rotated.reshape(bh, seqlen, n_hashes, n_buckets // 2)
    rotated = rotated.transpose(0, 2, 1, 3)                       # (bh,h,t,nb/2)
    rotated = jnp.concatenate([rotated, -rotated], axis=-1)       # (bh,h,t,nb)
    buckets = jnp.argmax(rotated, axis=-1).astype(jnp.int32)      # (bh,h,t)
    offsets = (jnp.arange(n_hashes, dtype=jnp.int32) * n_buckets).reshape(1, -1, 1)
    buckets = (buckets + offsets).reshape(bh, n_hashes * seqlen)

    # ---- sort by (bucket, position) -----------------------------------------
    ticker = jnp.arange(n_hashes * seqlen, dtype=jnp.int32)
    buckets_and_t = seqlen * buckets + (ticker % seqlen)[None, :]
    sticker = jnp.argsort(buckets_and_t, axis=-1).astype(jnp.int32)
    sbuckets_and_t = jnp.take_along_axis(buckets_and_t, sticker, axis=-1)
    undo_sort = jnp.argsort(sticker, axis=-1).astype(jnp.int32)

    st = sticker % seqlen
    sqk = jnp.take_along_axis(qk, st[:, :, None], axis=1)
    sv = jnp.take_along_axis(v, st[:, :, None], axis=1)

    bs = bucket_size
    bq_t = st.reshape(bh, chunks, bs)
    sqk_c = sqk.reshape(bh, chunks, bs, e)
    sv_c = sv.reshape(bh, chunks, bs, e)
    bq_buckets = (sbuckets_and_t // seqlen).reshape(bh, chunks, bs).astype(jnp.int32)

    # ---- duplicate-attention locations --------------------------------------
    locs1 = undo_sort // bs
    locs2 = (locs1 + 1) % chunks
    locs1 = buckets * chunks + locs1
    locs2 = buckets * chunks + locs2
    locs = jnp.concatenate(
        [locs1.reshape(bh, n_hashes, seqlen), locs2.reshape(bh, n_hashes, seqlen)],
        axis=1,
    ).transpose(0, 2, 1)                                          # (bh, t, 2h)
    slocs = jnp.take_along_axis(locs, st[:, :, None], axis=1)
    b_locs = slocs.reshape(bh, chunks, bs, 2 * n_hashes)
    bq_locs = jnp.concatenate(
        [b_locs[..., :n_hashes], b_locs[..., :n_hashes]], axis=-1
    )                                                             # (bh,C,bs,2h)

    # ---- packed metadata (one query-side array, one key-side array) --------
    qmeta = jnp.concatenate(
        [bq_t[..., None], bq_buckets[..., None], bq_locs], axis=-1
    ).astype(jnp.int32)                                           # (bh,C,bs,2+2h)
    kmeta = jnp.concatenate(
        [bq_t[..., None], bq_buckets[..., None], b_locs], axis=-1
    ).astype(jnp.int32)
    kmetaT = kmeta.transpose(0, 1, 3, 2)                          # (bh,C,2+2h,bs)

    # ---- per-chunk attention kernel -----------------------------------------
    bo, lse = lsh_chunk_attention(sqk_c, sv_c, qmeta, kmetaT, causal=causal)

    so = bo.reshape(bh, n_hashes * seqlen, e)
    slogits = lse.reshape(bh, n_hashes * seqlen)

    o = jnp.take_along_axis(so, undo_sort[:, :, None], axis=1)
    logits = jnp.take_along_axis(slogits, undo_sort, axis=-1)

    if n_hashes == 1:
        out = o
    else:
        o = o.reshape(bh, n_hashes, seqlen, e)
        logits = logits.reshape(bh, n_hashes, seqlen, 1)
        probs = jnp.exp(
            logits - jax.scipy.special.logsumexp(logits, axis=1, keepdims=True)
        )
        out = jnp.sum(o * probs, axis=1)
    return out


# ----------------------------------------------------------------------------
# LSHSelfAttention forward
# ----------------------------------------------------------------------------
def lsh_self_attention_forward(x, params, *, heads, bucket_size, n_hashes,
                               causal, rotation_key):
    b, t, e = x.shape
    h = heads
    assert t % bucket_size == 0

    x_flat = x.reshape(b * t, e)
    qk = pallas_linear(x_flat, params["w_qk"], params["b_qk"]).reshape(b, t, h * e)
    v = pallas_linear(x_flat, params["w_v"], params["b_v"]).reshape(b, t, h * e)

    def merge_heads(z):  # (b,t,h*e) -> (b*h, t, e)
        return z.reshape(b, t, h, e).transpose(0, 2, 1, 3).reshape(b * h, t, e)

    qk = merge_heads(qk)
    v = merge_heads(v)

    attn_out = lsh_attention(
        qk, v, bucket_size=bucket_size, n_hashes=n_hashes,
        causal=causal, rotation_key=rotation_key,
    )

    # split heads: (b*h, t, e) -> (b, t, h*e)
    out = attn_out.reshape(b, h, t, e).transpose(0, 2, 1, 3).reshape(b, t, h * e)
    out = pallas_linear(out.reshape(b * t, h * e), params["w_u"], params["b_u"])
    return out.reshape(b, t, e)


# ----------------------------------------------------------------------------
# main
# ----------------------------------------------------------------------------
if __name__ == "__main__":
    # small shapes consistent with the module
    b, t, e = 2, 16, 16
    heads = 2
    bucket_size = 4        # t / bucket_size = 4 buckets (even, as required)
    n_hashes = 2
    causal = False

    key = jax.random.PRNGKey(0)
    kx, kqk, kv, ku, kbqk, kbv, kbu, krot = jax.random.split(key, 8)

    x = jax.random.normal(kx, (b, t, e), dtype=jnp.float32)

    params = {
        "w_qk": 0.1 * jax.random.normal(kqk, (e, e * heads), dtype=jnp.float32),
        "b_qk": 0.1 * jax.random.normal(kbqk, (e * heads,), dtype=jnp.float32),
        "w_v": 0.1 * jax.random.normal(kv, (e, e * heads), dtype=jnp.float32),
        "b_v": 0.1 * jax.random.normal(kbv, (e * heads,), dtype=jnp.float32),
        "w_u": 0.1 * jax.random.normal(ku, (e * heads, e), dtype=jnp.float32),
        "b_u": 0.1 * jax.random.normal(kbu, (e,), dtype=jnp.float32),
    }

    out = lsh_self_attention_forward(
        x, params, heads=heads, bucket_size=bucket_size,
        n_hashes=n_hashes, causal=causal, rotation_key=krot,
    )
    out = jax.block_until_ready(out)
    assert out.shape == (b, t, e)
    assert bool(jnp.all(jnp.isfinite(out)))
    print("KERNEL_OK")
</pallas_src>

<mosaic_0001>
module attributes {stable_mosaic.version = 11 : i64} {
  func.func @_linear_kernel(%arg0: i32, %arg1: i32, %arg2: i32, %arg3: memref<32x16xf32, #tpu.memory_space<vmem>>, %arg4: memref<16x32xf32, #tpu.memory_space<vmem>>, %arg5: memref<1x32xf32, #tpu.memory_space<vmem>>, %arg6: memref<32x32xf32, #tpu.memory_space<vmem>>, %arg7: memref<32x32xf32, #tpu.memory_space<vmem>>) attributes {dimension_semantics = [#tpu.dimension_semantics<parallel>, #tpu.dimension_semantics<parallel>, #tpu.dimension_semantics<arbitrary>], iteration_bounds = array<i64: 1, 1, 1>, scalar_prefetch = 0 : i64, scratch_operands = 1 : i64, tpu.core_type = #tpu.core_type<tc>, window_params = [{transform_indices = @transform_0, window_bounds = array<i64: 32, 16>}, {transform_indices = @transform_1, window_bounds = array<i64: 16, 32>}, {transform_indices = @transform_2, window_bounds = array<i64: 1, 32>}, {transform_indices = @transform_3, window_bounds = array<i64: 32, 32>}]} {
    %c0_i32 = arith.constant 0 : i32
    %0 = arith.cmpi eq, %arg2, %c0_i32 : i32
    %1 = arith.extui %0 : i1 to i32
    %c0_i32_0 = arith.constant 0 : i32
    %2 = arith.cmpi ne, %1, %c0_i32_0 : i32
    scf.if %2 {
      %cst_10 = arith.constant 0.000000e+00 : f32
      %12 = vector.broadcast %cst_10 : f32 to vector<32x32xf32>
      %c0_11 = arith.constant 0 : index
      %c0_12 = arith.constant 0 : index
      %13 = vector.load %arg7[%c0_11, %c0_12] : memref<32x32xf32, #tpu.memory_space<vmem>>, vector<32x32xf32>
      tpu.vector_store %arg7[%c0_11, %c0_12], %12 {strides = array<i32>} : memref<32x32xf32, #tpu.memory_space<vmem>>, vector<32x32xf32>,
    } else {
    }
    %c0 = arith.constant 0 : index
    %c0_1 = arith.constant 0 : index
    %3 = vector.load %arg7[%c0, %c0_1] : memref<32x32xf32, #tpu.memory_space<vmem>>, vector<32x32xf32>
    %c0_2 = arith.constant 0 : index
    %c0_3 = arith.constant 0 : index
    %4 = vector.load %arg3[%c0_2, %c0_3] : memref<32x16xf32, #tpu.memory_space<vmem>>, vector<32x16xf32>
    %c0_4 = arith.constant 0 : index
    %c0_5 = arith.constant 0 : index
    %5 = vector.load %arg4[%c0_4, %c0_5] : memref<16x32xf32, #tpu.memory_space<vmem>>, vector<16x32xf32>
    %cst = arith.constant dense<0.000000e+00> : vector<32x32xf32>
    %6 = tpu.matmul %4, %5, %cst {dimension_numbers = #tpu.dot_dimension_numbers<[1], [0], [0], [1], [0, 0, 1, 1], [], []>} : vector<32x16xf32>, vector<16x32xf32>, vector<32x32xf32> -> vector<32x32xf32>
    %7 = arith.addf %3, %6 : vector<32x32xf32>
    %c0_6 = arith.constant 0 : index
    %c0_7 = arith.constant 0 : index
    %8 = vector.load %arg7[%c0_6, %c0_7] : memref<32x32xf32, #tpu.memory_space<vmem>>, vector<32x32xf32>
    tpu.vector_store %arg7[%c0_6, %c0_7], %7 {strides = array<i32>} : memref<32x32xf32, #tpu.memory_space<vmem>>, vector<32x32xf32>,
    %c0_i32_8 = arith.constant 0 : i32
    %9 = arith.cmpi eq, %arg2, %c0_i32_8 : i32
    %10 = arith.extui %9 : i1 to i32
    %c0_i32_9 = arith.constant 0 : i32
    %11 = arith.cmpi ne, %10, %c0_i32_9 : i32
    scf.if %11 {
      %c0_10 = arith.constant 0 : index
      %c0_11 = arith.constant 0 : index
      %12 = vector.load %arg7[%c0_10, %c0_11] : memref<32x32xf32, #tpu.memory_space<vmem>>, vector<32x32xf32>
      %c0_12 = arith.constant 0 : index
      %c0_13 = arith.constant 0 : index
      %13 = vector.load %arg5[%c0_12, %c0_13] : memref<1x32xf32, #tpu.memory_space<vmem>>, vector<1x32xf32>
      %14 = vector.broadcast %13 : vector<1x32xf32> to vector<32x32xf32>
      %15 = arith.addf %12, %14 : vector<32x32xf32>
      %c0_14 = arith.constant 0 : index
      %c0_15 = arith.constant 0 : index
      %16 = vector.load %arg6[%c0_14, %c0_15] : memref<32x32xf32, #tpu.memory_space<vmem>>, vector<32x32xf32>
      tpu.vector_store %arg6[%c0_14, %c0_15], %15 {strides = array<i32>} : memref<32x32xf32, #tpu.memory_space<vmem>>, vector<32x32xf32>,
    } else {
    }
    return
  }
  func.func @transform_0(%arg0: i32, %arg1: i32, %arg2: i32) -> (i32, i32) {
    %c0_i32 = arith.constant 0 : i32
    return %arg0, %arg2 : i32, i32
  }
  func.func @transform_1(%arg0: i32, %arg1: i32, %arg2: i32) -> (i32, i32) {
    %c0_i32 = arith.constant 0 : i32
    return %arg2, %arg1 : i32, i32
  }
  func.func @transform_2(%arg0: i32, %arg1: i32, %arg2: i32) -> (i32, i32) {
    %c0_i32 = arith.constant 0 : i32
    %c0_i32_0 = arith.constant 0 : i32
    return %c0_i32, %arg1 : i32, i32
  }
  func.func @transform_3(%arg0: i32, %arg1: i32, %arg2: i32) -> (i32, i32) {
    %c0_i32 = arith.constant 0 : i32
    return %arg0, %arg1 : i32, i32
  }
}

</mosaic_0001>

<bundles_post_ra>
// kernel: tpu_custom_call.1
= control target key start
LH: loop header
LB: loop body
LE: loop exit
PB: predicated region body
PF: predicated region fallthrough
CT: control target
= control target key end

     0   :  { %vm19_vm0 = vcmask 261120   ;;  %vm34_vm1 = vcmask 130048   ;;  %v163_v4 = vmov 0.0   ;;  %s227_s0 = inlined_call_operand.vmem [shape: f32[32,16], index: 0, kind: input, shape index: {}]   ;;  %s228_s1 = inlined_call_operand.vmem [shape: f32[16,32], index: 1, kind: input, shape index: {}]   ;;  %s229_s2 = inlined_call_operand.vmem [shape: f32[1,32], index: 2, kind: input, shape index: {}]   ;;  %s230_s3 = inlined_call_operand.hbm [shape: f32[32,32], index: 3, kind: output, shape index: {}]  }
   0x1   :  { %v33_v0 = vld [vmem:[%s228_s1 + $0x8] sm:$0xff]  ;;  %v32_v1 = vld [vmem:[%s228_s1] sm:$0xff]  ;;  %v30_v2 = vld [vmem:[%s227_s0 + $0x10] sm:$0xff]  ;;  %20 = vst.msk [vmem:[#allocation2] sm:$0xff] %vm19_vm0, %v163_v4 }
   0x2   :  { %127 = vmatpush.msra.mxu2 %v33_v0  ;;  %128 = vmatpush.msra.mxu3 %v33_v0  ;;  %v31_v3 = vld [vmem:[%s227_s0 + $0x18] sm:$0xff]  ;;  %21 = vst.msk [vmem:[#allocation2 + $0x8] sm:$0xff] %vm19_vm0, %v163_v4 }
   0x3   :  { %61 = vmatpush.msra.mxu0 %v33_v0  ;;  %126 = vmatpush.msra.mxu1 %v33_v0 }
   0x4   :  { %8 = vsyncpa [#allocation4], 0  ;;  %130 = vmatpush.msra.mxu2 %v32_v1  ;;  %131 = vmatpush.msra.mxu3 %v32_v1  ;;  %v28_v5 = vld [vmem:[%s227_s0] sm:$0xff]  ;;  %v29_v6 = vld [vmem:[%s227_s0 + $0x8] sm:$0xff]  ;;  %22 = vst.msk [vmem:[#allocation2 + $0x10] sm:$0xff] %vm19_vm0, %v163_v4  ;;  %s164_s24 = smov [#allocation3]  }
   0x5   :  { %124 = vmatmul.msk.f32.vlgmr.msra.gmra.mxu2 %vm34_vm1, %v30_v2  ;;  %125 = vmatmul.msk.f32.vlgmr.msra.gmra.mxu3 %vm34_vm1, %v31_v3  ;;  %23 = vst.msk [vmem:[#allocation2 + $0x18] sm:$0xff] %vm19_vm0, %v163_v4  ;;  %v136_v19 = vld [vmem:[%s229_s2] ss:$0 sm:$0xff]  ;;  %s108_s25 = sshll.u32 %s164_s24, 4  ;;  %s110_s28 = sshll.u32 %s230_s3, 4  ;;  %s109_s25 = int_to_ptr.vmem [resolvable:$true] %s108_s25  ;;  %s111_s28 = int_to_ptr.hbm [resolvable:$true] %s110_s28 }
   0x6   :  { %62 = vmatpush.msra.mxu0 %v32_v1  ;;  %129 = vmatpush.msra.mxu1 %v32_v1  ;;  %s165_s2 = smov 128   ;;  %s166_s29 = smov 8  }
   0x7   :  { %122 = vmatmul.msk.f32.vlgmr.msra.gmra.mxu0 %vm34_vm1, %v28_v5  ;;  %123 = vmatmul.msk.f32.vlgmr.msra.gmra.mxu1 %vm34_vm1, %v29_v6 }
   0x8   :  { %v24_v7 = vld [vmem:[#allocation2] sm:$0xff] }
   0x9   :  { %v25_v8 = vld [vmem:[#allocation2 + $0x8] sm:$0xff] }
   0xb   :  { %v26_v13 = vld [vmem:[#allocation2 + $0x10] sm:$0xff] }
   0xc   :  { %v27_v14 = vld [vmem:[#allocation2 + $0x18] sm:$0xff] }
  0x84   :  { %v64_v9 = vpop.f32.mrf.mxu0  ;;  %v67_v10 = vpop.f32.mrf.mxu1 }
  0x85   :  { %v76_v11 = vadd.f32 %v64_v9, %v24_v7  ;;  %v77_v12 = vadd.f32 %v67_v10, %v25_v8 }
  0x87   :  { %81 = vst.msk [vmem:[#allocation2] sm:$0xff] %vm19_vm0, %v76_v11 }
  0x88   :  { %82 = vst.msk [vmem:[#allocation2 + $0x8] sm:$0xff] %vm19_vm0, %v77_v12  ;;  %v70_v15 = vpop.f32.mrf.mxu2  ;;  %v73_v16 = vpop.f32.mrf.mxu3 }
  0x89   :  { %v78_v17 = vadd.f32 %v70_v15, %v26_v13  ;;  %v79_v18 = vadd.f32 %v73_v16, %v27_v14 }
  0x8b   :  { %83 = vst.msk [vmem:[#allocation2 + $0x10] sm:$0xff] %vm19_vm0, %v78_v17 }
  0x8c   :  { %84 = vst.msk [vmem:[#allocation2 + $0x18] sm:$0xff] %vm19_vm0, %v79_v18 }
  0x8e   :  { %v88_v20 = vld [vmem:[#allocation2] sm:$0xff] }
  0x8f   :  { %v89_v21 = vld [vmem:[#allocation2 + $0x8] sm:$0xff]  ;;  %v96_v22 = vadd.f32 %v136_v19, %v88_v20 }
  0x90   :  { %v97_v23 = vadd.f32 %v136_v19, %v89_v21 }
  0x91   :  { %100 = vst.msk [vmem:[#allocation3] sm:$0xff] %vm19_vm0, %v96_v22 }
  0x92   :  { %v90_v24 = vld [vmem:[#allocation2 + $0x10] sm:$0xff]  ;;  %101 = vst.msk [vmem:[#allocation3 + $0x8] sm:$0xff] %vm19_vm0, %v97_v23 }
  0x93   :  { %v91_v25 = vld [vmem:[#allocation2 + $0x18] sm:$0xff]  ;;  %v98_v26 = vadd.f32 %v136_v19, %v90_v24 }
  0x94   :  { %v99_v27 = vadd.f32 %v136_v19, %v91_v25 }
  0x95   :  { %102 = vst.msk [vmem:[#allocation3 + $0x10] sm:$0xff] %vm19_vm0, %v98_v26 }
  0x96   :  { %103 = vst.msk [vmem:[#allocation3 + $0x18] sm:$0xff] %vm19_vm0, %v99_v27 }
  0x97   :  { %116 = dma.vmem_to_hbm [thread:$0]  %s109_s25, 512, %s111_s28, [#allocation4], %s165_s2, %s165_s2, %s166_s29  }
  0x98   :  { %161 = dma.done.wait [#allocation4], 512  }
  0x99   :  { %162 = vsyncadd [#allocation4], 4294966784 }
  0x9a   :  { %121 = vsyncpa [#allocation4], 1 }

</bundles_post_ra>
